<compile_context>
chip_gen: v5e
topology: v5e:2x2
jax: 0.10.0
libtpu: 0.0.40
codegen_flags: <defaults>
</compile_context>

<pallas_src>
import jax
import jax.numpy as jnp
from jax.experimental import pallas as pl
from jax.experimental.pallas import tpu as pltpu


_PC_LANES = 128  # lane-dense width for the projected_control output slab


def _round_up(x, m):
    return ((x + m - 1) // m) * m


def write_unit_kernel(memory_ref, read_info_ref, control_ref,
                      w_mi_ref, b_mi_ref,     # (4H, 2H), (1, 2H)
                      w_pc_ref, b_pc_ref,     # (1, 2H),  (1, 1) in SMEM
                      minfo_out_ref, pc_out_ref):
    memory = memory_ref[...]        # (TB, 2H)
    read_info = read_info_ref[...]  # (TB, 2H)
    control = control_ref[...]      # (TB, 2H)

    h2 = w_mi_ref.shape[1]          # 2*hidden (static)

    # minfo = Linear(4H -> 2H)(cat([memory, read_info], dim=-1))
    # Split the contraction instead of materializing a lane-axis concat:
    #   cat([m, r]) @ W == m @ W[:2H] + r @ W[2H:]
    minfo = (jnp.dot(memory, w_mi_ref[:h2, :],
                     preferred_element_type=jnp.float32)
             + jnp.dot(read_info, w_mi_ref[h2:, :],
                       preferred_element_type=jnp.float32)
             + b_mi_ref[...])                                   # (TB, 2H)
    minfo_out_ref[...] = minfo.astype(minfo_out_ref.dtype)

    # projected_control = sigmoid(Linear(2H -> 1)(control))
    # w_pc stored as a (1, 2H) row vector -> VPU mul + lane reduction.
    logits = (jnp.sum(control * w_pc_ref[...], axis=-1, keepdims=True)
              + b_pc_ref[0, 0])                                 # (TB, 1)
    pc = jax.nn.sigmoid(logits)

    # Store lane-dense (broadcast across 128 lanes -> unmasked vst); the
    # wrapper slices column 0 back out.
    pc_out_ref[...] = jnp.broadcast_to(pc, pc_out_ref.shape).astype(
        pc_out_ref.dtype)


def write_unit(memory, read_info, control, prev_controls, prev_memories,
               params, *, block_b=128):
    """Returns (minfo, projected_control), matching WriteUnit.forward.

    prev_controls / prev_memories are accepted for interface parity with the
    PyTorch module but are dead w.r.t. the returned outputs, so they never
    reach the kernel (no HBM->VMEM DMA for them).
    """
    del prev_controls, prev_memories  # dead code in the torch forward's outputs

    B, H2 = memory.shape

    # Batch tile: multiple of 8 sublanes, capped at block_b.
    tb = min(block_b, _round_up(B, 8))
    b_pad = _round_up(B, tb)

    def pad_b(x):
        return x if b_pad == B else jnp.pad(x, ((0, b_pad - B), (0, 0)))

    memory_p = pad_b(memory)
    read_info_p = pad_b(read_info)
    control_p = pad_b(control)

    grid = (b_pad // tb,)

    act_spec = pl.BlockSpec((tb, H2), lambda i: (i, 0))

    def resident_spec(a):
        # Whole-array weight block, constant index_map -> stays in VMEM.
        return pl.BlockSpec(a.shape, lambda i: (0,) * a.ndim)

    in_specs = [
        act_spec, act_spec, act_spec,
        resident_spec(params["w_mi"]),
        resident_spec(params["b_mi"]),
        resident_spec(params["w_pc"]),
        pl.BlockSpec(memory_space=pltpu.MemorySpace.SMEM),   # b_pc scalar
    ]

    out_shapes = (jax.ShapeDtypeStruct((b_pad, H2), jnp.float32),        # minfo
                  jax.ShapeDtypeStruct((b_pad, _PC_LANES), jnp.float32)) # pc slab
    out_specs = (pl.BlockSpec((tb, H2), lambda i: (i, 0)),
                 pl.BlockSpec((tb, _PC_LANES), lambda i: (i, 0)))

    minfo, pc_lanes = pl.pallas_call(
        write_unit_kernel,
        out_shape=out_shapes,
        grid=grid,
        in_specs=in_specs,
        out_specs=out_specs,
        compiler_params=pltpu.CompilerParams(
            dimension_semantics=("parallel",)),
    )(memory_p, read_info_p, control_p,
      params["w_mi"], params["b_mi"], params["w_pc"], params["b_pc"])

    return minfo[:B], pc_lanes[:B, :1]


def write_unit_ref(memory, read_info, control, params):
    """Plain-JAX reference of the torch forward's returned values."""
    x = jnp.concatenate([memory, read_info], axis=-1)
    minfo = x @ params["w_mi"] + params["b_mi"]
    pc = jax.nn.sigmoid(
        jnp.sum(control * params["w_pc"], axis=-1, keepdims=True)
        + params["b_pc"][0, 0])
    return minfo, pc


def init_params(key, hidden_size):
    """Deterministic synthetic init of WriteUnit's Linear layers.

    The attend / project_memory / project_memories layers exist in the torch
    module but feed only the never-returned `mi`, so they are initialized for
    parity but never consumed by the kernel.
    """
    H2, H4 = 2 * hidden_size, 4 * hidden_size
    ks = jax.random.split(key, 10)
    scale = 0.05

    def w(k, shape):
        return (scale * jax.random.normal(k, shape)).astype(jnp.float32)

    return {
        # memory_info: Linear(4H -> 2H), stored (in, out)
        "w_mi": w(ks[0], (H4, H2)), "b_mi": w(ks[1], (1, H2)),
        # attend: Linear(2H -> 1)              (unused by forward outputs)
        "w_att": w(ks[2], (1, H2)), "b_att": w(ks[3], (1, 1)),
        # project_memory: Linear(2H -> 2H)     (unused by forward outputs)
        "w_pm": w(ks[4], (H2, H2)), "b_pm": w(ks[5], (1, H2)),
        # project_memories: Linear(2H -> 2H)   (unused by forward outputs)
        "w_pms": w(ks[6], (H2, H2)), "b_pms": w(ks[7], (1, H2)),
        # project_control: Linear(2H -> 1), stored as (1, 2H) row vector
        "w_pc": w(ks[8], (1, H2)), "b_pc": w(ks[9], (1, 1)),
    }


if __name__ == "__main__":
    key = jax.random.PRNGKey(0)
    # B multiple of 8 (sublanes), hidden=64 -> H2=128 (lane-dense).
    B, hidden, T = 8, 64, 6
    H2 = 2 * hidden

    k_param, k_mem, k_read, k_ctrl, k_pc, k_pm = jax.random.split(key, 6)
    params = init_params(k_param, hidden)

    memory = jax.random.normal(k_mem, (B, H2), dtype=jnp.float32)
    read_info = jax.random.normal(k_read, (B, H2), dtype=jnp.float32)
    control = jax.random.normal(k_ctrl, (B, H2), dtype=jnp.float32)
    prev_controls = jax.random.normal(k_pc, (T, B, H2), dtype=jnp.float32)
    prev_memories = jax.random.normal(k_pm, (T, B, H2), dtype=jnp.float32)

    minfo, projected_control = write_unit(
        memory, read_info, control, prev_controls, prev_memories, params)
    jax.block_until_ready((minfo, projected_control))

    assert minfo.shape == (B, H2)
    assert projected_control.shape == (B, 1)

    minfo_ref, pc_ref = write_unit_ref(memory, read_info, control, params)
    assert jnp.allclose(minfo, minfo_ref, atol=2e-3, rtol=2e-3)
    assert jnp.allclose(projected_control, pc_ref, atol=2e-3, rtol=2e-3)

    print("KERNEL_OK")
</pallas_src>

<mosaic_0001>
module attributes {stable_mosaic.version = 11 : i64} {
  func.func @write_unit_kernel(%arg0: i32, %arg1: memref<8x128xf32, #tpu.memory_space<vmem>>, %arg2: memref<8x128xf32, #tpu.memory_space<vmem>>, %arg3: memref<8x128xf32, #tpu.memory_space<vmem>>, %arg4: memref<256x128xf32, #tpu.memory_space<vmem>>, %arg5: memref<1x128xf32, #tpu.memory_space<vmem>>, %arg6: memref<1x128xf32, #tpu.memory_space<vmem>>, %arg7: memref<1x1xf32, #tpu.memory_space<smem>>, %arg8: memref<8x128xf32, #tpu.memory_space<vmem>>, %arg9: memref<8x128xf32, #tpu.memory_space<vmem>>) attributes {dimension_semantics = [#tpu.dimension_semantics<parallel>], iteration_bounds = array<i64: 1>, scalar_prefetch = 0 : i64, scratch_operands = 0 : i64, tpu.core_type = #tpu.core_type<tc>, window_params = [{transform_indices = @transform_0, window_bounds = array<i64: 8, 128>}, {transform_indices = @transform_1, window_bounds = array<i64: 8, 128>}, {transform_indices = @transform_2, window_bounds = array<i64: 8, 128>}, {pipeline_mode = #tpu.pipeline_mode<synchronous>, transform_indices = @transform_3, window_bounds = array<i64: 256, 128>}, {pipeline_mode = #tpu.pipeline_mode<synchronous>, transform_indices = @transform_4, window_bounds = array<i64: 1, 128>}, {pipeline_mode = #tpu.pipeline_mode<synchronous>, transform_indices = @transform_5, window_bounds = array<i64: 1, 128>}, {transform_indices = @transform_6, window_bounds = array<i64: 1, 1>}, {transform_indices = @transform_7, window_bounds = array<i64: 8, 128>}, {transform_indices = @transform_8, window_bounds = array<i64: 8, 128>}]} {
    %c0 = arith.constant 0 : index
    %c0_0 = arith.constant 0 : index
    %0 = vector.load %arg1[%c0, %c0_0] : memref<8x128xf32, #tpu.memory_space<vmem>>, vector<8x128xf32>
    %c0_1 = arith.constant 0 : index
    %c0_2 = arith.constant 0 : index
    %1 = vector.load %arg2[%c0_1, %c0_2] : memref<8x128xf32, #tpu.memory_space<vmem>>, vector<8x128xf32>
    %c0_3 = arith.constant 0 : index
    %c0_4 = arith.constant 0 : index
    %2 = vector.load %arg3[%c0_3, %c0_4] : memref<8x128xf32, #tpu.memory_space<vmem>>, vector<8x128xf32>
    %c0_5 = arith.constant 0 : index
    %c0_6 = arith.constant 0 : index
    %3 = vector.load %arg4[%c0_5, %c0_6] : memref<256x128xf32, #tpu.memory_space<vmem>>, vector<128x128xf32>
    %cst = arith.constant dense<0.000000e+00> : vector<8x128xf32>
    %4 = tpu.matmul %0, %3, %cst {dimension_numbers = #tpu.dot_dimension_numbers<[1], [0], [0], [1], [0, 0, 1, 1], [], []>} : vector<8x128xf32>, vector<128x128xf32>, vector<8x128xf32> -> vector<8x128xf32>
    %c128 = arith.constant 128 : index
    %c0_7 = arith.constant 0 : index
    %5 = vector.load %arg4[%c128, %c0_7] : memref<256x128xf32, #tpu.memory_space<vmem>>, vector<128x128xf32>
    %cst_8 = arith.constant dense<0.000000e+00> : vector<8x128xf32>
    %6 = tpu.matmul %1, %5, %cst_8 {dimension_numbers = #tpu.dot_dimension_numbers<[1], [0], [0], [1], [0, 0, 1, 1], [], []>} : vector<8x128xf32>, vector<128x128xf32>, vector<8x128xf32> -> vector<8x128xf32>
    %7 = arith.addf %4, %6 : vector<8x128xf32>
    %c0_9 = arith.constant 0 : index
    %c0_10 = arith.constant 0 : index
    %8 = vector.load %arg5[%c0_9, %c0_10] : memref<1x128xf32, #tpu.memory_space<vmem>>, vector<1x128xf32>
    %9 = vector.broadcast %8 : vector<1x128xf32> to vector<8x128xf32>
    %10 = arith.addf %7, %9 : vector<8x128xf32>
    %c0_11 = arith.constant 0 : index
    %c0_12 = arith.constant 0 : index
    %11 = vector.load %arg8[%c0_11, %c0_12] : memref<8x128xf32, #tpu.memory_space<vmem>>, vector<8x128xf32>
    tpu.vector_store %arg8[%c0_11, %c0_12], %10 {strides = array<i32>} : memref<8x128xf32, #tpu.memory_space<vmem>>, vector<8x128xf32>,
    %c0_13 = arith.constant 0 : index
    %c0_14 = arith.constant 0 : index
    %12 = vector.load %arg6[%c0_13, %c0_14] : memref<1x128xf32, #tpu.memory_space<vmem>>, vector<1x128xf32>
    %13 = vector.broadcast %12 : vector<1x128xf32> to vector<8x128xf32>
    %14 = arith.mulf %2, %13 : vector<8x128xf32>
    %cst_15 = arith.constant dense<0.000000e+00> : vector<8xf32>
    %15 = vector.multi_reduction <add>, %14, %cst_15 [1] : vector<8x128xf32> to vector<8xf32>
    %16 = vector.shape_cast %15 : vector<8xf32> to vector<8x1xf32>
    %c0_16 = arith.constant 0 : index
    %c0_17 = arith.constant 0 : index
    %17 = memref.load %arg7[%c0_16, %c0_17] : memref<1x1xf32, #tpu.memory_space<smem>>
    %18 = vector.broadcast %17 : f32 to vector<8x1xf32>
    %19 = arith.addf %16, %18 : vector<8x1xf32>
    %20 = arith.negf %19 : vector<8x1xf32>
    %21 = math.exp %20 : vector<8x1xf32>
    %cst_18 = arith.constant 1.000000e+00 : f32
    %22 = vector.broadcast %cst_18 : f32 to vector<8x1xf32>
    %23 = arith.addf %22, %21 : vector<8x1xf32>
    %24 = arith.divf %22, %23 : vector<8x1xf32>
    %25 = vector.shape_cast %24 : vector<8x1xf32> to vector<8x1xf32>
    %26 = vector.broadcast %25 : vector<8x1xf32> to vector<8x128xf32>
    %c0_19 = arith.constant 0 : index
    %c0_20 = arith.constant 0 : index
    %27 = vector.load %arg9[%c0_19, %c0_20] : memref<8x128xf32, #tpu.memory_space<vmem>>, vector<8x128xf32>
    tpu.vector_store %arg9[%c0_19, %c0_20], %26 {strides = array<i32>} : memref<8x128xf32, #tpu.memory_space<vmem>>, vector<8x128xf32>,
    return
  }
  func.func @transform_0(%arg0: i32) -> (i32, i32) {
    %c0_i32 = arith.constant 0 : i32
    %c0_i32_0 = arith.constant 0 : i32
    return %arg0, %c0_i32 : i32, i32
  }
  func.func @transform_1(%arg0: i32) -> (i32, i32) {
    %c0_i32 = arith.constant 0 : i32
    %c0_i32_0 = arith.constant 0 : i32
    return %arg0, %c0_i32 : i32, i32
  }
  func.func @transform_2(%arg0: i32) -> (i32, i32) {
    %c0_i32 = arith.constant 0 : i32
    %c0_i32_0 = arith.constant 0 : i32
    return %arg0, %c0_i32 : i32, i32
  }
  func.func @transform_3(%arg0: i32) -> (i32, i32) {
    %c0_i32 = arith.constant 0 : i32
    %c0_i32_0 = arith.constant 0 : i32
    %c0_i32_1 = arith.constant 0 : i32
    return %c0_i32, %c0_i32_0 : i32, i32
  }
  func.func @transform_4(%arg0: i32) -> (i32, i32) {
    %c0_i32 = arith.constant 0 : i32
    %c0_i32_0 = arith.constant 0 : i32
    %c0_i32_1 = arith.constant 0 : i32
    return %c0_i32, %c0_i32_0 : i32, i32
  }
  func.func @transform_5(%arg0: i32) -> (i32, i32) {
    %c0_i32 = arith.constant 0 : i32
    %c0_i32_0 = arith.constant 0 : i32
    %c0_i32_1 = arith.constant 0 : i32
    return %c0_i32, %c0_i32_0 : i32, i32
  }
  func.func @transform_6(%arg0: i32) -> (i32, i32) {
    %c0_i32 = arith.constant 0 : i32
    %c0_i32_0 = arith.constant 0 : i32
    %c0_i32_1 = arith.constant 0 : i32
    return %c0_i32, %c0_i32_0 : i32, i32
  }
  func.func @transform_7(%arg0: i32) -> (i32, i32) {
    %c0_i32 = arith.constant 0 : i32
    %c0_i32_0 = arith.constant 0 : i32
    return %arg0, %c0_i32 : i32, i32
  }
  func.func @transform_8(%arg0: i32) -> (i32, i32) {
    %c0_i32 = arith.constant 0 : i32
    %c0_i32_0 = arith.constant 0 : i32
    return %arg0, %c0_i32 : i32, i32
  }
}

</mosaic_0001>

<bundles_post_ra>
// kernel: tpu_custom_call.1
= control target key start
LH: loop header
LB: loop body
LE: loop exit
PB: predicated region body
PF: predicated region fallthrough
CT: control target
= control target key end

     0   :  { %15 = vsyncpa [#allocation4], 0  ;;  %s483_s0 = inlined_call_operand.hbm [shape: f32[8,128], index: 0, kind: input, shape index: {}]   ;;  %s484_s1 = inlined_call_operand.hbm [shape: f32[8,128], index: 1, kind: input, shape index: {}]   ;;  %s485_s2 = inlined_call_operand.hbm [shape: f32[8,128], index: 2, kind: input, shape index: {}]   ;;  %s486_s3 = inlined_call_operand.hbm [shape: f32[256,128], index: 3, kind: input, shape index: {}]   ;;  %s487_s4 = inlined_call_operand.vmem [shape: f32[1,128], index: 4, kind: input, shape index: {}]   ;;  %s488_s5 = inlined_call_operand.vmem [shape: f32[1,128], index: 5, kind: input, shape index: {}]   ;;  %s489_s6 = inlined_call_operand.<no memory space> [shape: f32[1,1], index: 6, kind: input, shape index: {}]   ;;  %s490_s7 = inlined_call_operand.hbm [shape: f32[8,128], index: 7, kind: output, shape index: {0}]   ;;  %s491_s8 = inlined_call_operand.hbm [shape: f32[8,128], index: 8, kind: output, shape index: {1}]  }
   0x1   :  { %16 = vsyncpa [#allocation7], 0 }
   0x2   :  { %17 = vsyncpa [#allocation10], 0 }
   0x3   :  { %18 = vsyncpa [#allocation5], 0  ;;  %s36_s29 = sshll.u32 %s484_s1, 4  ;;  %s37_s29 = int_to_ptr.hbm [resolvable:$true] %s36_s29 }
   0x4   :  { %19 = vsyncpa [#allocation13], 0  ;;  %s403_s30 = smov [#allocation6]   ;;  %s25_s12 = sshll.u32 %s483_s0, 4  ;;  %s26_s12 = int_to_ptr.hbm [resolvable:$true] %s25_s12 }
   0x5   :  { %s38_s9 = sshll.u32 %s403_s30, 4  ;;  %s404_s13 = smov [#allocation3]   ;;  %s39_s9 = int_to_ptr.vmem [resolvable:$true] %s38_s9 }
   0x6   :  { %41 = dma.hbm_to_vmem [thread:$0]  %s37_s29, 128, %s39_s9, [#allocation7]  }
   0x7   :  { %s27_s14 = sshll.u32 %s404_s13, 4  ;;  %s47_s17 = sshll.u32 %s485_s2, 4  ;;  %s28_s14 = int_to_ptr.vmem [resolvable:$true] %s27_s14  ;;  %s48_s17 = int_to_ptr.hbm [resolvable:$true] %s47_s17 }
   0x8   :  { %30 = dma.hbm_to_vmem [thread:$0]  %s26_s12, 128, %s28_s14, [#allocation4]  }
   0x9   :  { %s57_s19 = sshll.u32 %s486_s3, 4  ;;  %s405_s20 = smov [#allocation8]   ;;  %s58_s19 = int_to_ptr.hbm [resolvable:$true] %s57_s19 }
   0xa   :  { %s49_s21 = sshll.u32 %s405_s20, 4  ;;  %s406_s0 = smov [#allocation9]   ;;  %s50_s21 = int_to_ptr.vmem [resolvable:$true] %s49_s21 }
   0xb   :  { %52 = dma.hbm_to_vmem [thread:$0]  %s48_s17, 128, %s50_s21, [#allocation7]  }
   0xc   :  { %s59_s22 = sshll.u32 %s406_s0, 4  ;;  %s407_s23 = smov 128   ;;  %s60_s22 = int_to_ptr.vmem [resolvable:$true] %s59_s22 }
   0xd   :  { %s408_s24 = smov 8  }
   0xe   :  { %65 = dma.hbm_to_vmem [thread:$0]  %s58_s19, 4096, %s60_s22, [#allocation10], %s407_s23, %s407_s23, %s408_s24  }
   0xf   :  { %393 = dma.done.wait [#allocation4], 128  }
  0x10   :  { %394 = vsyncadd [#allocation4], 4294967168 }
  0x11   :  { %395 = dma.done.wait [#allocation7], 256  }
  0x12   :  { %396 = vsyncadd [#allocation7], 4294967040 }
  0x13   :  { %397 = dma.done.wait [#allocation10], 4096  }
  0x14   :  { %398 = vsyncadd [#allocation10], 4294963200  ;;  %v122_v0 = vld [vmem:[#allocation9 + $0xf8] sm:$0xff]  ;;  %v121_v2 = vld [vmem:[#allocation9 + $0xf0] sm:$0xff]  ;;  %v177_v37 = vstv %s489_s6  ;;  %s409_s26 = smov [#allocation12]   ;;  %s217_s29 = sshll.u32 %s491_s8, 4  ;;  %s218_s29 = int_to_ptr.hbm [resolvable:$true] %s217_s29 }
  0x15   :  { %v106_v1 = vld [vmem:[#allocation9 + $0x78] sm:$0xff]  ;;  %123 = vmatpush.msra.mxu0 %v122_v0  ;;  %v105_v3 = vld [vmem:[#allocation9 + $0x70] sm:$0xff]  ;;  %v120_v4 = vld [vmem:[#allocation9 + $0xe8] sm:$0xff]  ;;  %s215_s27 = sshll.u32 %s409_s26, 4  ;;  %s410_s10 = smov [#allocation11]   ;;  %s216_s27 = int_to_ptr.vmem [resolvable:$true] %s215_s27 }
  0x16   :  { %143 = vmatpush.msra.mxu1 %v106_v1  ;;  %v104_v5 = vld [vmem:[#allocation9 + $0x68] sm:$0xff]  ;;  %v90_v6 = vld [vmem:[#allocation8] sm:$0xff]  ;;  %v119_v9 = vld [vmem:[#allocation9 + $0xe0] sm:$0xff]  ;;  %s204_s11 = sshll.u32 %s410_s10, 4  ;;  %s206_s8 = sshll.u32 %s490_s7, 4  ;;  %s205_s11 = int_to_ptr.vmem [resolvable:$true] %s204_s11  ;;  %s207_s8 = int_to_ptr.hbm [resolvable:$true] %s206_s8 }
  0x17   :  { %v243_v7 = vld [vmem:[%s488_s5] ss:$0 sm:$0xff]  ;;  %124 = vmatpush.msra.mxu0 %v121_v2  ;;  %v103_v10 = vld [vmem:[#allocation9 + $0x60] sm:$0xff]  ;;  %v118_v11 = vld [vmem:[#allocation9 + $0xd8] sm:$0xff] }
  0x18   :  { %144 = vmatpush.msra.mxu1 %v105_v3  ;;  %v173_v8 = vmul.f32 %v243_v7, %v90_v6  ;;  %v102_v12 = vld [vmem:[#allocation9 + $0x58] sm:$0xff]  ;;  %v117_v13 = vld [vmem:[#allocation9 + $0xd0] sm:$0xff]  ;;  %v116_v15 = vld [vmem:[#allocation9 + $0xc8] sm:$0xff] }
  0x19   :  { %125 = vmatpush.msra.mxu0 %v120_v4  ;;  %v101_v14 = vld [vmem:[#allocation9 + $0x50] sm:$0xff]  ;;  %v100_v16 = vld [vmem:[#allocation9 + $0x48] sm:$0xff]  ;;  %v115_v17 = vld [vmem:[#allocation9 + $0xc0] sm:$0xff] }
  0x1a   :  { %145 = vmatpush.msra.mxu1 %v104_v5  ;;  %174 = vadd.xlane.f32.xlu0 %v173_v8  ;;  %v99_v18 = vld [vmem:[#allocation9 + $0x40] sm:$0xff]  ;;  %v114_v19 = vld [vmem:[#allocation9 + $0xb8] sm:$0xff]  ;;  %v113_v21 = vld [vmem:[#allocation9 + $0xb0] sm:$0xff] }
  0x1b   :  { %126 = vmatpush.msra.mxu0 %v119_v9  ;;  %v98_v20 = vld [vmem:[#allocation9 + $0x38] sm:$0xff]  ;;  %v97_v22 = vld [vmem:[#allocation9 + $0x30] sm:$0xff]  ;;  %v112_v23 = vld [vmem:[#allocation9 + $0xa8] sm:$0xff] }
  0x1c   :  { %146 = vmatpush.msra.mxu1 %v103_v10  ;;  %v96_v24 = vld [vmem:[#allocation9 + $0x28] sm:$0xff]  ;;  %v111_v25 = vld [vmem:[#allocation9 + $0xa0] sm:$0xff]  ;;  %v110_v27 = vld [vmem:[#allocation9 + $0x98] sm:$0xff] }
  0x1d   :  { %127 = vmatpush.msra.mxu0 %v118_v11  ;;  %v95_v26 = vld [vmem:[#allocation9 + $0x20] sm:$0xff]  ;;  %v94_v28 = vld [vmem:[#allocation9 + $0x18] sm:$0xff]  ;;  %v109_v29 = vld [vmem:[#allocation9 + $0x90] sm:$0xff] }
  0x1e   :  { %147 = vmatpush.msra.mxu1 %v102_v12  ;;  %v93_v30 = vld [vmem:[#allocation9 + $0x10] sm:$0xff]  ;;  %v108_v31 = vld [vmem:[#allocation9 + $0x88] sm:$0xff]  ;;  %v107_v33 = vld [vmem:[#allocation9 + $0x80] sm:$0xff] }
  0x1f   :  { %128 = vmatpush.msra.mxu0 %v117_v13  ;;  %v92_v32 = vld [vmem:[#allocation9 + $0x8] sm:$0xff]  ;;  %v91_v34 = vld [vmem:[#allocation9] sm:$0xff]  ;;  %v89_v35 = vld [vmem:[#allocation6] sm:$0xff] }
  0x20   :  { %148 = vmatpush.msra.mxu1 %v101_v14  ;;  %v88_v36 = vld [vmem:[#allocation3] sm:$0xff] }
  0x21   :  { %129 = vmatpush.msra.mxu0 %v116_v15  ;;  %v244_v53 = vld [vmem:[%s487_s4] ss:$0 sm:$0xff] }
  0x22   :  { %149 = vmatpush.msra.mxu1 %v100_v16 }
  0x23   :  { %130 = vmatpush.msra.mxu0 %v115_v17 }
  0x24   :  { %150 = vmatpush.msra.mxu1 %v99_v18 }
  0x25   :  { %131 = vmatpush.msra.mxu0 %v114_v19 }
  0x26   :  { %151 = vmatpush.msra.mxu1 %v98_v20 }
  0x27   :  { %132 = vmatpush.msra.mxu0 %v113_v21 }
  0x28   :  { %152 = vmatpush.msra.mxu1 %v97_v22 }
  0x29   :  { %133 = vmatpush.msra.mxu0 %v112_v23 }
  0x2a   :  { %153 = vmatpush.msra.mxu1 %v96_v24 }
  0x2b   :  { %134 = vmatpush.msra.mxu0 %v111_v25 }
  0x2c   :  { %154 = vmatpush.msra.mxu1 %v95_v26 }
  0x2d   :  { %135 = vmatpush.msra.mxu0 %v110_v27 }
  0x2e   :  { %155 = vmatpush.msra.mxu1 %v94_v28 }
  0x2f   :  { %136 = vmatpush.msra.mxu0 %v109_v29 }
  0x30   :  { %156 = vmatpush.msra.mxu1 %v93_v30 }
  0x31   :  { %137 = vmatpush.msra.mxu0 %v108_v31 }
  0x32   :  { %157 = vmatpush.msra.mxu1 %v92_v32 }
  0x33   :  { %138 = vmatpush.msra.mxu0 %v107_v33 }
  0x34   :  { %158 = vmatpush.msra.mxu1 %v91_v34  ;;  %139 = vmatmul.f32.vlgmr.msra.gmra.mxu0 %v89_v35 }
  0x35   :  { %159 = vmatmul.f32.vlgmr.msra.gmra.mxu1 %v88_v36 }
  0x8d   :  { %v175_v38 = vpop.xlane.xlu0 %174 }
  0x8e   :  { %v178_v39 = vadd.f32 %v177_v37, %v175_v38 }
  0x90   :  { %v234_v40 = vmul.f32 -1.442695, %v178_v39 }
  0x92   :  { %245 = vpow2.f32 %v234_v40 }
  0x98   :  { %v246_v41 = vpop.eup %245 }
  0x99   :  { %v182_v42 = vadd.f32 1.0, %v246_v41 }
  0x9b   :  { %247 = vrcp.f32 %v182_v42  ;;  %v194_v45 = vand.u32 2147483648, %v182_v42  ;;  %vm188_vm0 = vweird.f32 %v182_v42  ;;  %v192_v47 = vand.u32 2147483647, %v182_v42 }
  0x9d   :  { %v195_v49 = vor.u32 1.1754944e-38, %v194_v45  ;;  %vm193_vm3 = vcmp.eq.f32.partialorder %v192_v47, 8.507059e+37 }
  0xa1   :  { %v248_v43 = vpop.eup %247 }
  0xa2   :  { %v184_v44 = vmul.f32 %v248_v43, %v182_v42  ;;  %vm189_vm1 = vweird.f32 %v248_v43 }
  0xa3   :  { %vm190_vm2 = vmor %vm188_vm0, %vm189_vm1 }
  0xa4   :  { %v185_v46 = vsub.f32 1.0, %v184_v44 }
  0xa6   :  { %v186_v48 = vmul.f32 %v248_v43, %v185_v46 }
  0xa8   :  { %v187_v50 = vadd.f32 %v248_v43, %v186_v48 }
  0xaa   :  { %v191_v51 = vsel %vm190_vm2, %v248_v43, %v187_v50 }
  0xab   :  { %v196_v52 = vsel %vm193_vm3, %v195_v49, %v191_v51 }
  0xac   :  { %198 = vst [vmem:[#allocation12] sm:$0xff] %v196_v52 }
  0xad   :  { %220 = dma.vmem_to_hbm [thread:$0]  %s216_s27, 128, %s218_s29, [#allocation13]  }
  0xb1   :  { %v140_v54 = vpop.f32.mrf.mxu0 }
  0xb2   :  { %v160_v55 = vpop.f32.mrf.mxu1 }
  0xb3   :  { %v161_v56 = vadd.f32 %v160_v55, %v140_v54 }
  0xb5   :  { %v167_v57 = vadd.f32 %v244_v53, %v161_v56 }
  0xb7   :  { %168 = vst [vmem:[#allocation11] sm:$0xff] %v167_v57 }
  0xb8   :  { %209 = dma.vmem_to_hbm [thread:$0]  %s205_s11, 128, %s207_s8, [#allocation5]  }
  0xb9   :  { %399 = dma.done.wait [#allocation5], 128  }
  0xba   :  { %400 = vsyncadd [#allocation5], 4294967168 }
  0xbb   :  { %401 = dma.done.wait [#allocation13], 128  }
  0xbc   :  { %402 = vsyncadd [#allocation13], 4294967168 }
  0xbd   :  { %229 = vsyncpa [#allocation4], 1 }
  0xbe   :  { %230 = vsyncpa [#allocation7], 1 }
  0xbf   :  { %231 = vsyncpa [#allocation10], 1 }
  0xc0   :  { %232 = vsyncpa [#allocation5], 1 }
  0xc1   :  { %233 = vsyncpa [#allocation13], 1 }

</bundles_post_ra>
